<compile_context>
chip_gen: v7x
topology: tpu7x:2x2x1
jax: 0.10.0
libtpu: 0.0.40
codegen_flags: <defaults>
</compile_context>

<pallas_src>
import functools

import jax
import jax.numpy as jnp
from jax import lax
from jax.experimental import pallas as pl
from jax.experimental.pallas import tpu as pltpu

_LANES = 128


def _neg_pearson_kernel(preds_ref, labels_ref, out_ref,
                        sx_ref, sy_ref, sxy_ref, sx2_ref, sy2_ref, *, n_true):
    k = pl.program_id(1)                      # sequence-tile (reduction) axis
    tb, tn = preds_ref.shape
    n_chunks = tn // _LANES

    @pl.when(k == 0)
    def _init():
        zeros = jnp.zeros((tb, _LANES), jnp.float32)
        sx_ref[...] = zeros
        sy_ref[...] = zeros
        sxy_ref[...] = zeros
        sx2_ref[...] = zeros
        sy2_ref[...] = zeros

    # Per-tile partial sums, folded lane-wise into (tb, 128) registers so the
    # inner loop is pure load + multiply + add on the VPU; the single lane
    # reduction per quantity happens once in the finalize step.
    x0 = preds_ref[:, 0:_LANES].astype(jnp.float32)
    y0 = labels_ref[:, 0:_LANES].astype(jnp.float32)
    sx, sy = x0, y0
    sxy, sx2, sy2 = x0 * y0, x0 * x0, y0 * y0
    for c in range(1, n_chunks):
        lo = c * _LANES
        xc = preds_ref[:, lo:lo + _LANES].astype(jnp.float32)
        yc = labels_ref[:, lo:lo + _LANES].astype(jnp.float32)
        sx = sx + xc
        sy = sy + yc
        sxy = sxy + xc * yc
        sx2 = sx2 + xc * xc
        sy2 = sy2 + yc * yc

    sx_ref[...] += sx
    sy_ref[...] += sy
    sxy_ref[...] += sxy
    sx2_ref[...] += sx2
    sy2_ref[...] += sy2

    @pl.when(k == pl.num_programs(1) - 1)
    def _finalize():
        n = jnp.float32(n_true)
        sum_x = jnp.sum(sx_ref[...], axis=1, keepdims=True)    # (tb, 1)
        sum_y = jnp.sum(sy_ref[...], axis=1, keepdims=True)
        sum_xy = jnp.sum(sxy_ref[...], axis=1, keepdims=True)
        sum_x2 = jnp.sum(sx2_ref[...], axis=1, keepdims=True)
        sum_y2 = jnp.sum(sy2_ref[...], axis=1, keepdims=True)

        num = n * sum_xy - sum_x * sum_y
        var_x = n * sum_x2 - sum_x * sum_x
        var_y = n * sum_y2 - sum_y * sum_y
        # PyTorch branch: p>=0 -> 1-p, p<0 -> 1-|p|; both equal 1-|p|.
        # rsqrt of each factor replaces sqrt+divide and avoids f32 overflow
        # of the product var_x*var_y for large N.
        pearson_abs = jnp.abs(num) * lax.rsqrt(var_x) * lax.rsqrt(var_y)
        per_row = 1.0 - pearson_abs                              # (tb, 1)
        # Lane-dense write (unmasked vst); wrapper reads lane 0.
        out_ref[...] = jnp.broadcast_to(per_row, out_ref.shape)


def neg_pearson_loss(preds, labels, *, tile_n=None, row_blocks=None):
    """Pallas implementation of Neg_Pearson.forward. preds/labels: (B, N)."""
    assert preds.shape == labels.shape and preds.ndim == 2
    B, N = preds.shape

    # Leading 'parallel' grid axis over row blocks (uses both v7x TensorCores
    # when B allows a sublane-aligned split); otherwise a single row block.
    if row_blocks is None:
        row_blocks = 2 if (B % 16 == 0) else 1
    assert B % row_blocks == 0
    tb = B // row_blocks
    assert tb == B or tb % 8 == 0, "row block must be full batch or multiple of 8"

    # Sequence tile: large enough to amortize per-grid-step overhead, small
    # enough that 2 inputs x 2 pipeline buffers stay well under scoped VMEM
    # (32 MiB requested below; safe on v5e/v6e/v7x).
    n_pad = ((N + _LANES - 1) // _LANES) * _LANES
    if tile_n is None:
        vmem_cap = max(_LANES,
                       ((8 * 1024 * 1024) // (16 * tb)) // _LANES * _LANES)
        tile_n = min(n_pad, 2048, vmem_cap)
    assert tile_n % _LANES == 0
    n_pad = ((n_pad + tile_n - 1) // tile_n) * tile_n
    n_tiles = n_pad // tile_n

    if n_pad != N:
        pad = ((0, 0), (0, n_pad - N))        # zero padding is sum-neutral
        preds = jnp.pad(preds, pad)
        labels = jnp.pad(labels, pad)

    kernel = functools.partial(_neg_pearson_kernel, n_true=float(N))

    per_row = pl.pallas_call(
        kernel,
        out_shape=jax.ShapeDtypeStruct((B, _LANES), jnp.float32),
        grid_spec=pltpu.PrefetchScalarGridSpec(
            num_scalar_prefetch=0,
            grid=(row_blocks, n_tiles),                    # reduction axis last
            in_specs=[
                pl.BlockSpec((tb, tile_n), lambda b, k: (b, k)),
                pl.BlockSpec((tb, tile_n), lambda b, k: (b, k)),
            ],
            out_specs=pl.BlockSpec((tb, _LANES), lambda b, k: (b, 0)),
            scratch_shapes=[pltpu.VMEM((tb, _LANES), jnp.float32)
                            for _ in range(5)],
        ),
        compiler_params=pltpu.CompilerParams(
            dimension_semantics=("parallel", "arbitrary"),
            vmem_limit_bytes=32 * 1024 * 1024,
        ),
    )(preds, labels)

    # per_row[:, 0] = 1 - |pearson_i|; batch mean gives the loss
    # (tiny O(B) combine done here so parallel row blocks stay independent).
    return jnp.sum(per_row[:, 0]) / B


def _neg_pearson_ref(preds, labels):
    """Pure-JAX reference mirroring the PyTorch loop semantics."""
    preds = preds.astype(jnp.float32)
    labels = labels.astype(jnp.float32)
    B, N = preds.shape
    n = jnp.float32(N)
    sum_x = jnp.sum(preds, axis=1)
    sum_y = jnp.sum(labels, axis=1)
    sum_xy = jnp.sum(preds * labels, axis=1)
    sum_x2 = jnp.sum(preds * preds, axis=1)
    sum_y2 = jnp.sum(labels * labels, axis=1)
    pearson = (n * sum_xy - sum_x * sum_y) / jnp.sqrt(
        (n * sum_x2 - sum_x ** 2) * (n * sum_y2 - sum_y ** 2))
    per_row = jnp.where(pearson >= 0.0, 1.0 - pearson, 1.0 - jnp.abs(pearson))
    return jnp.sum(per_row) / B


if __name__ == "__main__":
    key = jax.random.PRNGKey(0)
    configs = [
        (4, 200, {}),                   # ragged N -> zero-padding path
        (4, 512, dict(tile_n=128)),     # multi-tile reduction grid (4 steps)
        (16, 384, dict(tile_n=128)),    # row_blocks=2 -> parallel grid axis
    ]
    for B, N, kwargs in configs:
        key, k1, k2 = jax.random.split(key, 3)
        preds = jax.random.normal(k1, (B, N), dtype=jnp.float32)
        labels = 0.5 * preds + 0.5 * jax.random.normal(k2, (B, N),
                                                       dtype=jnp.float32)
        loss = jax.block_until_ready(neg_pearson_loss(preds, labels, **kwargs))
        ref = jax.block_until_ready(_neg_pearson_ref(preds, labels))
        assert jnp.allclose(loss, ref, atol=1e-4, rtol=1e-4), (B, N, loss, ref)

    print("KERNEL_OK")
</pallas_src>

<mosaic_0001>
module attributes {stable_mosaic.version = 11 : i64} {
  func.func @_neg_pearson_kernel(%arg0: i32, %arg1: i32, %arg2: memref<4x256xf32, #tpu.memory_space<vmem>>, %arg3: memref<4x256xf32, #tpu.memory_space<vmem>>, %arg4: memref<4x128xf32, #tpu.memory_space<vmem>>, %arg5: memref<4x128xf32, #tpu.memory_space<vmem>>, %arg6: memref<4x128xf32, #tpu.memory_space<vmem>>, %arg7: memref<4x128xf32, #tpu.memory_space<vmem>>, %arg8: memref<4x128xf32, #tpu.memory_space<vmem>>, %arg9: memref<4x128xf32, #tpu.memory_space<vmem>>) attributes {dimension_semantics = [#tpu.dimension_semantics<parallel>, #tpu.dimension_semantics<arbitrary>], iteration_bounds = array<i64: 1, 1>, scalar_prefetch = 0 : i64, scratch_operands = 5 : i64, tpu.core_type = #tpu.core_type<tc>, window_params = [{transform_indices = @transform_0, window_bounds = array<i64: 4, 256>}, {transform_indices = @transform_1, window_bounds = array<i64: 4, 256>}, {transform_indices = @transform_2, window_bounds = array<i64: 4, 128>}]} {
    %c0_i32 = arith.constant 0 : i32
    %0 = arith.cmpi eq, %arg1, %c0_i32 : i32
    %1 = arith.extui %0 : i1 to i32
    %c0_i32_0 = arith.constant 0 : i32
    %2 = arith.cmpi ne, %1, %c0_i32_0 : i32
    scf.if %2 {
      %cst = arith.constant 0.000000e+00 : f32
      %36 = vector.broadcast %cst : f32 to vector<4x128xf32>
      %c0_29 = arith.constant 0 : index
      %c0_30 = arith.constant 0 : index
      %37 = vector.load %arg5[%c0_29, %c0_30] : memref<4x128xf32, #tpu.memory_space<vmem>>, vector<4x128xf32>
      tpu.vector_store %arg5[%c0_29, %c0_30], %36 {strides = array<i32>} : memref<4x128xf32, #tpu.memory_space<vmem>>, vector<4x128xf32>,
      %c0_31 = arith.constant 0 : index
      %c0_32 = arith.constant 0 : index
      %38 = vector.load %arg6[%c0_31, %c0_32] : memref<4x128xf32, #tpu.memory_space<vmem>>, vector<4x128xf32>
      tpu.vector_store %arg6[%c0_31, %c0_32], %36 {strides = array<i32>} : memref<4x128xf32, #tpu.memory_space<vmem>>, vector<4x128xf32>,
      %c0_33 = arith.constant 0 : index
      %c0_34 = arith.constant 0 : index
      %39 = vector.load %arg7[%c0_33, %c0_34] : memref<4x128xf32, #tpu.memory_space<vmem>>, vector<4x128xf32>
      tpu.vector_store %arg7[%c0_33, %c0_34], %36 {strides = array<i32>} : memref<4x128xf32, #tpu.memory_space<vmem>>, vector<4x128xf32>,
      %c0_35 = arith.constant 0 : index
      %c0_36 = arith.constant 0 : index
      %40 = vector.load %arg8[%c0_35, %c0_36] : memref<4x128xf32, #tpu.memory_space<vmem>>, vector<4x128xf32>
      tpu.vector_store %arg8[%c0_35, %c0_36], %36 {strides = array<i32>} : memref<4x128xf32, #tpu.memory_space<vmem>>, vector<4x128xf32>,
      %c0_37 = arith.constant 0 : index
      %c0_38 = arith.constant 0 : index
      %41 = vector.load %arg9[%c0_37, %c0_38] : memref<4x128xf32, #tpu.memory_space<vmem>>, vector<4x128xf32>
      tpu.vector_store %arg9[%c0_37, %c0_38], %36 {strides = array<i32>} : memref<4x128xf32, #tpu.memory_space<vmem>>, vector<4x128xf32>,
    } else {
    }
    %c0 = arith.constant 0 : index
    %c0_1 = arith.constant 0 : index
    %3 = vector.load %arg2[%c0, %c0_1] : memref<4x256xf32, #tpu.memory_space<vmem>>, vector<4x128xf32>
    %c0_2 = arith.constant 0 : index
    %c0_3 = arith.constant 0 : index
    %4 = vector.load %arg3[%c0_2, %c0_3] : memref<4x256xf32, #tpu.memory_space<vmem>>, vector<4x128xf32>
    %5 = arith.mulf %3, %4 : vector<4x128xf32>
    %6 = arith.mulf %3, %3 : vector<4x128xf32>
    %7 = arith.mulf %4, %4 : vector<4x128xf32>
    %c0_4 = arith.constant 0 : index
    %c128 = arith.constant 128 : index
    %8 = vector.load %arg2[%c0_4, %c128] : memref<4x256xf32, #tpu.memory_space<vmem>>, vector<4x128xf32>
    %c0_5 = arith.constant 0 : index
    %c128_6 = arith.constant 128 : index
    %9 = vector.load %arg3[%c0_5, %c128_6] : memref<4x256xf32, #tpu.memory_space<vmem>>, vector<4x128xf32>
    %10 = arith.addf %3, %8 : vector<4x128xf32>
    %11 = arith.addf %4, %9 : vector<4x128xf32>
    %12 = arith.mulf %8, %9 : vector<4x128xf32>
    %13 = arith.addf %5, %12 : vector<4x128xf32>
    %14 = arith.mulf %8, %8 : vector<4x128xf32>
    %15 = arith.addf %6, %14 : vector<4x128xf32>
    %16 = arith.mulf %9, %9 : vector<4x128xf32>
    %17 = arith.addf %7, %16 : vector<4x128xf32>
    %c0_7 = arith.constant 0 : index
    %c0_8 = arith.constant 0 : index
    %18 = vector.load %arg5[%c0_7, %c0_8] : memref<4x128xf32, #tpu.memory_space<vmem>>, vector<4x128xf32>
    %19 = arith.addf %18, %10 : vector<4x128xf32>
    %c0_9 = arith.constant 0 : index
    %c0_10 = arith.constant 0 : index
    %20 = vector.load %arg5[%c0_9, %c0_10] : memref<4x128xf32, #tpu.memory_space<vmem>>, vector<4x128xf32>
    tpu.vector_store %arg5[%c0_9, %c0_10], %19 {strides = array<i32>} : memref<4x128xf32, #tpu.memory_space<vmem>>, vector<4x128xf32>,
    %c0_11 = arith.constant 0 : index
    %c0_12 = arith.constant 0 : index
    %21 = vector.load %arg6[%c0_11, %c0_12] : memref<4x128xf32, #tpu.memory_space<vmem>>, vector<4x128xf32>
    %22 = arith.addf %21, %11 : vector<4x128xf32>
    %c0_13 = arith.constant 0 : index
    %c0_14 = arith.constant 0 : index
    %23 = vector.load %arg6[%c0_13, %c0_14] : memref<4x128xf32, #tpu.memory_space<vmem>>, vector<4x128xf32>
    tpu.vector_store %arg6[%c0_13, %c0_14], %22 {strides = array<i32>} : memref<4x128xf32, #tpu.memory_space<vmem>>, vector<4x128xf32>,
    %c0_15 = arith.constant 0 : index
    %c0_16 = arith.constant 0 : index
    %24 = vector.load %arg7[%c0_15, %c0_16] : memref<4x128xf32, #tpu.memory_space<vmem>>, vector<4x128xf32>
    %25 = arith.addf %24, %13 : vector<4x128xf32>
    %c0_17 = arith.constant 0 : index
    %c0_18 = arith.constant 0 : index
    %26 = vector.load %arg7[%c0_17, %c0_18] : memref<4x128xf32, #tpu.memory_space<vmem>>, vector<4x128xf32>
    tpu.vector_store %arg7[%c0_17, %c0_18], %25 {strides = array<i32>} : memref<4x128xf32, #tpu.memory_space<vmem>>, vector<4x128xf32>,
    %c0_19 = arith.constant 0 : index
    %c0_20 = arith.constant 0 : index
    %27 = vector.load %arg8[%c0_19, %c0_20] : memref<4x128xf32, #tpu.memory_space<vmem>>, vector<4x128xf32>
    %28 = arith.addf %27, %15 : vector<4x128xf32>
    %c0_21 = arith.constant 0 : index
    %c0_22 = arith.constant 0 : index
    %29 = vector.load %arg8[%c0_21, %c0_22] : memref<4x128xf32, #tpu.memory_space<vmem>>, vector<4x128xf32>
    tpu.vector_store %arg8[%c0_21, %c0_22], %28 {strides = array<i32>} : memref<4x128xf32, #tpu.memory_space<vmem>>, vector<4x128xf32>,
    %c0_23 = arith.constant 0 : index
    %c0_24 = arith.constant 0 : index
    %30 = vector.load %arg9[%c0_23, %c0_24] : memref<4x128xf32, #tpu.memory_space<vmem>>, vector<4x128xf32>
    %31 = arith.addf %30, %17 : vector<4x128xf32>
    %c0_25 = arith.constant 0 : index
    %c0_26 = arith.constant 0 : index
    %32 = vector.load %arg9[%c0_25, %c0_26] : memref<4x128xf32, #tpu.memory_space<vmem>>, vector<4x128xf32>
    tpu.vector_store %arg9[%c0_25, %c0_26], %31 {strides = array<i32>} : memref<4x128xf32, #tpu.memory_space<vmem>>, vector<4x128xf32>,
    %c0_i32_27 = arith.constant 0 : i32
    %33 = arith.cmpi eq, %arg1, %c0_i32_27 : i32
    %34 = arith.extui %33 : i1 to i32
    %c0_i32_28 = arith.constant 0 : i32
    %35 = arith.cmpi ne, %34, %c0_i32_28 : i32
    scf.if %35 {
      %c0_29 = arith.constant 0 : index
      %c0_30 = arith.constant 0 : index
      %36 = vector.load %arg5[%c0_29, %c0_30] : memref<4x128xf32, #tpu.memory_space<vmem>>, vector<4x128xf32>
      %cst = arith.constant dense<0.000000e+00> : vector<4xf32>
      %37 = vector.multi_reduction <add>, %36, %cst [1] : vector<4x128xf32> to vector<4xf32>
      %38 = vector.shape_cast %37 : vector<4xf32> to vector<4x1xf32>
      %c0_31 = arith.constant 0 : index
      %c0_32 = arith.constant 0 : index
      %39 = vector.load %arg6[%c0_31, %c0_32] : memref<4x128xf32, #tpu.memory_space<vmem>>, vector<4x128xf32>
      %cst_33 = arith.constant dense<0.000000e+00> : vector<4xf32>
      %40 = vector.multi_reduction <add>, %39, %cst_33 [1] : vector<4x128xf32> to vector<4xf32>
      %41 = vector.shape_cast %40 : vector<4xf32> to vector<4x1xf32>
      %c0_34 = arith.constant 0 : index
      %c0_35 = arith.constant 0 : index
      %42 = vector.load %arg7[%c0_34, %c0_35] : memref<4x128xf32, #tpu.memory_space<vmem>>, vector<4x128xf32>
      %cst_36 = arith.constant dense<0.000000e+00> : vector<4xf32>
      %43 = vector.multi_reduction <add>, %42, %cst_36 [1] : vector<4x128xf32> to vector<4xf32>
      %44 = vector.shape_cast %43 : vector<4xf32> to vector<4x1xf32>
      %c0_37 = arith.constant 0 : index
      %c0_38 = arith.constant 0 : index
      %45 = vector.load %arg8[%c0_37, %c0_38] : memref<4x128xf32, #tpu.memory_space<vmem>>, vector<4x128xf32>
      %cst_39 = arith.constant dense<0.000000e+00> : vector<4xf32>
      %46 = vector.multi_reduction <add>, %45, %cst_39 [1] : vector<4x128xf32> to vector<4xf32>
      %47 = vector.shape_cast %46 : vector<4xf32> to vector<4x1xf32>
      %c0_40 = arith.constant 0 : index
      %c0_41 = arith.constant 0 : index
      %48 = vector.load %arg9[%c0_40, %c0_41] : memref<4x128xf32, #tpu.memory_space<vmem>>, vector<4x128xf32>
      %cst_42 = arith.constant dense<0.000000e+00> : vector<4xf32>
      %49 = vector.multi_reduction <add>, %48, %cst_42 [1] : vector<4x128xf32> to vector<4xf32>
      %50 = vector.shape_cast %49 : vector<4xf32> to vector<4x1xf32>
      %cst_43 = arith.constant 2.000000e+02 : f32
      %51 = vector.broadcast %cst_43 : f32 to vector<4x1xf32>
      %52 = arith.mulf %51, %44 : vector<4x1xf32>
      %53 = arith.mulf %38, %41 : vector<4x1xf32>
      %54 = arith.subf %52, %53 : vector<4x1xf32>
      %cst_44 = arith.constant 2.000000e+02 : f32
      %55 = vector.broadcast %cst_44 : f32 to vector<4x1xf32>
      %56 = arith.mulf %55, %47 : vector<4x1xf32>
      %57 = arith.mulf %38, %38 : vector<4x1xf32>
      %58 = arith.subf %56, %57 : vector<4x1xf32>
      %cst_45 = arith.constant 2.000000e+02 : f32
      %59 = vector.broadcast %cst_45 : f32 to vector<4x1xf32>
      %60 = arith.mulf %59, %50 : vector<4x1xf32>
      %61 = arith.mulf %41, %41 : vector<4x1xf32>
      %62 = arith.subf %60, %61 : vector<4x1xf32>
      %63 = math.absf %54 : vector<4x1xf32>
      %64 = math.rsqrt %58 : vector<4x1xf32>
      %65 = arith.mulf %63, %64 : vector<4x1xf32>
      %66 = math.rsqrt %62 : vector<4x1xf32>
      %67 = arith.mulf %65, %66 : vector<4x1xf32>
      %cst_46 = arith.constant 1.000000e+00 : f32
      %68 = vector.broadcast %cst_46 : f32 to vector<4x1xf32>
      %69 = arith.subf %68, %67 : vector<4x1xf32>
      %70 = vector.shape_cast %69 : vector<4x1xf32> to vector<4x1xf32>
      %71 = vector.broadcast %70 : vector<4x1xf32> to vector<4x128xf32>
      %c0_47 = arith.constant 0 : index
      %c0_48 = arith.constant 0 : index
      %72 = vector.load %arg4[%c0_47, %c0_48] : memref<4x128xf32, #tpu.memory_space<vmem>>, vector<4x128xf32>
      tpu.vector_store %arg4[%c0_47, %c0_48], %71 {strides = array<i32>} : memref<4x128xf32, #tpu.memory_space<vmem>>, vector<4x128xf32>,
    } else {
    }
    return
  }
  func.func @transform_0(%arg0: i32, %arg1: i32) -> (i32, i32) {
    %c0_i32 = arith.constant 0 : i32
    return %arg0, %arg1 : i32, i32
  }
  func.func @transform_1(%arg0: i32, %arg1: i32) -> (i32, i32) {
    %c0_i32 = arith.constant 0 : i32
    return %arg0, %arg1 : i32, i32
  }
  func.func @transform_2(%arg0: i32, %arg1: i32) -> (i32, i32) {
    %c0_i32 = arith.constant 0 : i32
    %c0_i32_0 = arith.constant 0 : i32
    return %arg0, %c0_i32 : i32, i32
  }
}

</mosaic_0001>

<bundles_post_ra>
// kernel: tpu_custom_call.1
= control target key start
LH: loop header
LB: loop body
LE: loop exit
PB: predicated region body
PF: predicated region fallthrough
CT: control target
= control target key end

     0   :  { %7 = vsyncpa [#allocation8], 0  ;;  %s266_s0 = inlined_call_operand.hbm [shape: f32[4,256], index: 0, kind: input, shape index: {}]   ;;  %s267_s1 = inlined_call_operand.hbm [shape: f32[4,256], index: 1, kind: input, shape index: {}]   ;;  %s268_s2 = inlined_call_operand.hbm [shape: f32[4,128], index: 2, kind: output, shape index: {}]  }
   0x1   :  { %8 = vsyncpa [#allocation11], 0 }
   0x2   :  { %9 = vsyncpa [#allocation9], 0  ;;  %s211_s9 = smov [#allocation7]   ;;  %s212_s11 = smov [#allocation10]  }
   0x3   :  { %s16_s10 = sshll.u32 %s211_s9, 4  ;;  %s26_s12 = sshll.u32 %s212_s11, 4  ;;  %s17_s10 = int_to_ptr.vmem [resolvable:$true] %s16_s10  ;;  %s27_s12 = int_to_ptr.vmem [resolvable:$true] %s26_s12 }
   0x4   :  { %s139_s15 = scalar_lea.hbm %s266_s0, 128 }
   0x5   :  { %p140_p0 = scmp.ne.s32.totalorder %s266_s0, %s139_s15  ;;  %p143_p1 = scmp.lt.u32.totalorder %s139_s15, %s266_s0 }
   0x7   :  { %p145_p2 = pnand %p143_p1, %p140_p0 }
   0x9   :  { %148 = shalt.err (!%p145_p2)
}
   0xa   :  { %s149_s20 = scalar_lea.vmem %s17_s10, 128  ;;  %p154_p4 = scmp.lt.s32.totalorder %s17_s10, %s17_s10 }
   0xb   :  { %p150_p3 = scmp.ne.s32.totalorder %s17_s10, %s149_s20  ;;  %p155_p5 = scmp.lt.s32.totalorder %s149_s20, %s149_s20 }
   0xd   :  { %p156_p6 = por %p155_p5, %p154_p4 }
   0xf   :  { %p157_p7 = pnand %p156_p6, %p150_p3 }
  0x11   :  { %160 = shalt.err (!%p157_p7)
}
  0x12   :  { %19 = dma.hbm_to_vmem [thread:$0]  %s266_s0, 128, %s17_s10, [#allocation8]  }
  0x13   :  { %s161_s25 = scalar_lea.hbm %s267_s1, 128 }
  0x14   :  { %p162_p8 = scmp.ne.s32.totalorder %s267_s1, %s161_s25  ;;  %p165_p9 = scmp.lt.u32.totalorder %s161_s25, %s267_s1 }
  0x16   :  { %p167_p10 = pnand %p165_p9, %p162_p8 }
  0x18   :  { %170 = shalt.err (!%p167_p10)
}
  0x19   :  { %s171_s30 = scalar_lea.vmem %s27_s12, 128  ;;  %p176_p12 = scmp.lt.s32.totalorder %s27_s12, %s27_s12 }
  0x1a   :  { %p172_p11 = scmp.ne.s32.totalorder %s27_s12, %s171_s30  ;;  %p177_p13 = scmp.lt.s32.totalorder %s171_s30, %s171_s30 }
  0x1c   :  { %p178_p0 = por %p177_p13, %p176_p12 }
  0x1e   :  { %p179_p1 = pnand %p178_p0, %p172_p11 }
  0x20   :  { %182 = shalt.err (!%p179_p1)
}
  0x21   :  { %29 = dma.hbm_to_vmem [thread:$0]  %s267_s1, 128, %s27_s12, [#allocation11]  }
  0x22   :  { %205 = dma.done.wait [#allocation8], 128  }
  0x23   :  { %206 = vsyncadd [#allocation8], 4294967168 }
  0x24   :  { %207 = dma.done.wait [#allocation11], 128  }
  0x25   :  { %208 = vsyncadd [#allocation11], 4294967168  ;;  %v213_v0 = vmov 0.0   ;;  %v46_v1 = vld [vmem:[#allocation10] sm:$0xf]  ;;  %vm79_vm0 = vcmask 1043456  }
  0x26   :  { %41 = vst [vmem:[#allocation3] sm:$0xf] %v213_v0  ;;  %40 = vst [vmem:[#allocation2] sm:$0xf] %v213_v0  ;;  %v51_v2 = vld [vmem:[#allocation10 + $0x4] sm:$0xf]  ;;  %v49_v8 = vmul.f32 %v46_v1, %v46_v1 }
  0x27   :  { %42 = vst [vmem:[#allocation4] sm:$0xf] %v213_v0  ;;  %43 = vst [vmem:[#allocation5] sm:$0xf] %v213_v0  ;;  %v45_v3 = vld [vmem:[#allocation7] sm:$0xf]  ;;  %v53_v4 = vadd.f32 %v51_v2, %v46_v1  ;;  %v58_v9 = vmul.f32 %v51_v2, %v51_v2 }
  0x28   :  { %44 = vst [vmem:[#allocation6] sm:$0xf] %v213_v0  ;;  %v50_v6 = vld [vmem:[#allocation7 + $0x4] sm:$0xf]  ;;  %v48_v10 = vmul.f32 %v45_v3, %v45_v3  ;;  %v47_v14 = vmul.f32 %v46_v1, %v45_v3  ;;  %s214_s1 = smov [#allocation12]  }
  0x29   :  { %v52_v11 = vadd.f32 %v50_v6, %v45_v3  ;;  %v56_v13 = vmul.f32 %v50_v6, %v50_v6  ;;  %v54_v15 = vmul.f32 %v51_v2, %v50_v6  ;;  %v59_v17 = vadd.f32 %v58_v9, %v49_v8  ;;  %s121_s4 = sshll.u32 %s214_s1, 4  ;;  %s122_s4 = int_to_ptr.vmem [resolvable:$true] %s121_s4 }
  0x2a   :  { %s183_s5 = scalar_lea.vmem %s122_s4, 64  ;;  %p188_p3 = scmp.lt.s32.totalorder %s122_s4, %s122_s4 }
  0x2b   :  { %v57_v21 = vadd.f32 %v56_v13, %v48_v10  ;;  %v55_v22 = vadd.f32 %v54_v15, %v47_v14  ;;  %p184_p2 = scmp.ne.s32.totalorder %s122_s4, %s183_s5  ;;  %p189_p4 = scmp.lt.s32.totalorder %s183_s5, %s183_s5 }
  0x2d   :  { %v63_v5 = vld [vmem:[#allocation3] sm:$0xf]  ;;  %v60_v7 = vld [vmem:[#allocation2] sm:$0xf]  ;;  %p190_p5 = por %p189_p4, %p188_p3 }
  0x2e   :  { %v64_v16 = vadd.f32 %v63_v5, %v53_v4  ;;  %v69_v18 = vld [vmem:[#allocation5] sm:$0xf]  ;;  %v66_v19 = vld [vmem:[#allocation4] sm:$0xf]  ;;  %v61_v20 = vadd.f32 %v60_v7, %v52_v11 }
  0x2f   :  { %v72_v12 = vld [vmem:[#allocation6] sm:$0xf]  ;;  %v70_v24 = vadd.f32 %v69_v18, %v57_v21  ;;  %v67_v25 = vadd.f32 %v66_v19, %v55_v22  ;;  %p191_p6 = pnand %p190_p5, %p184_p2 }
  0x30   :  { %65 = vst [vmem:[#allocation3] sm:$0xf] %v64_v16  ;;  %v73_v23 = vadd.f32 %v72_v12, %v59_v17  ;;  %62 = vst [vmem:[#allocation2] sm:$0xf] %v61_v20 }
  0x31   :  { %71 = vst [vmem:[#allocation5] sm:$0xf] %v70_v24  ;;  %68 = vst [vmem:[#allocation4] sm:$0xf] %v67_v25 }
  0x32   :  { %74 = vst [vmem:[#allocation6] sm:$0xf] %v73_v23 }
  0x37   :  { %v83_v26 = vld [vmem:[#allocation3] sm:$0xf]  ;;  %v78_v28 = vld [vmem:[#allocation2] sm:$0xf] }
  0x38   :  { %v84_v27 = vsel %vm79_vm0, %v83_v26, 0.0  ;;  %v80_v29 = vsel %vm79_vm0, %v78_v28, 0.0  ;;  %v91_v32 = vld [vmem:[#allocation5] sm:$0xf]  ;;  %v87_v34 = vld [vmem:[#allocation4] sm:$0xf] }
  0x39   :  { %85 = vadd.xlane.f32.xlu1 %v84_v27  ;;  %v95_v30 = vld [vmem:[#allocation6] sm:$0xf]  ;;  %81 = vadd.xlane.f32.xlu0 %v80_v29  ;;  %v92_v33 = vsel %vm79_vm0, %v91_v32, 0.0  ;;  %v88_v35 = vsel %vm79_vm0, %v87_v34, 0.0 }
  0x3a   :  { %v96_v31 = vsel %vm79_vm0, %v95_v30, 0.0 }
  0x3d   :  { %97 = vadd.xlane.f32.xlu1 %v96_v31  ;;  %93 = vadd.xlane.f32.xlu0 %v92_v33 }
  0x41   :  { %89 = vadd.xlane.f32.xlu0 %v88_v35 }
  0xc6   :  { %v86_v36 = vpop.xlane.xlu1 %85  ;;  %v82_v37 = vpop.xlane.xlu0 %81 }
  0xc7   :  { %v106_v41 = vmul.f32 %v86_v36, %v86_v36  ;;  %v103_v42 = vmul.f32 %v82_v37, %v82_v37  ;;  %v100_v48 = vmul.f32 %v86_v36, %v82_v37 }
  0xca   :  { %v98_v38 = vpop.xlane.xlu1 %97  ;;  %v94_v40 = vpop.xlane.xlu0 %93 }
  0xcb   :  { %v105_v39 = vmul.f32 200.0, %v98_v38  ;;  %v102_v43 = vmul.f32 200.0, %v94_v40 }
  0xcd   :  { %v107_v44 = vsub.f32 %v105_v39, %v106_v41  ;;  %v104_v45 = vsub.f32 %v102_v43, %v103_v42 }
  0xce   :  { %v90_v46 = vpop.xlane.xlu0 %89 }
  0xcf   :  { %135 = vrsqrt.f32 %v104_v45  ;;  %v99_v47 = vmul.f32 200.0, %v90_v46 }
  0xd0   :  { %137 = vrsqrt.f32 %v107_v44 }
  0xd1   :  { %v101_v49 = vsub.f32 %v99_v47, %v100_v48 }
  0xd3   :  { %v108_v50 = vand.u32 2147483647, %v101_v49 }
  0xd9   :  { %v136_v51 = vpop.eup %135 }
  0xda   :  { %v110_v52 = vmul.f32 %v136_v51, %v108_v50  ;;  %v138_v53 = vpop.eup %137 }
  0xdc   :  { %v112_v54 = vmul.f32 %v138_v53, %v110_v52 }
  0xde   :  { %v113_v55 = vsub.f32 1.0, %v112_v54 }
  0xe0   :  { %114 = vst [vmem:[#allocation12] sm:$0xf] %v113_v55 }
  0xe1   :  { %194 = shalt.err (!%p191_p6)
}
  0xe2   :  { %s195_s8 = scalar_lea.hbm %s268_s2, 64 }
  0xe3   :  { %p196_p7 = scmp.ne.s32.totalorder %s268_s2, %s195_s8  ;;  %p199_p8 = scmp.lt.u32.totalorder %s195_s8, %s268_s2 }
  0xe5   :  { %p201_p9 = pnand %p199_p8, %p196_p7 }
  0xe7   :  { %204 = shalt.err (!%p201_p9)
}
  0xe8   :  { %124 = dma.vmem_to_hbm [thread:$0]  %s122_s4, 64, %s268_s2, [#allocation9]  }
  0xe9   :  { %209 = dma.done.wait [#allocation9], 64  }
  0xea   :  { %210 = vsyncadd [#allocation9], 4294967232 }
  0xeb   :  { %128 = vsyncpa [#allocation8], 1 }
  0xec   :  { %129 = vsyncpa [#allocation11], 1 }
  0xed   :  { %130 = vsyncpa [#allocation9], 1 }

</bundles_post_ra>
